<compile_context>
chip_gen: v7x
topology: tpu7x:2x2x1
jax: 0.10.0
libtpu: 0.0.40
codegen_flags: <defaults>
</compile_context>

<pallas_src>
import functools

import jax
import jax.numpy as jnp
from jax import lax
from jax.experimental import pallas as pl
from jax.experimental.pallas import tpu as pltpu


def _my_layernorm_kernel(x_ref, gamma_ref, o_ref, *, eps, c_valid):
    # x_ref: (Bt, L, Cp) VMEM block; gamma_ref: (1, Cp) VMEM.
    x = x_ref[...].astype(jnp.float32)                       # (Bt, L, Cp)
    bt, sl, cp = x.shape

    inv_c = jnp.float32(1.0 / c_valid)

    # --- LayerNorm statistics over the (real) channel lanes ---
    mu = jnp.sum(x, axis=-1, keepdims=True) * inv_c          # (Bt, L, 1)
    xc = x - mu
    if c_valid != cp:
        # Padded lanes hold zeros in x; mask their (x - mu) so variance is exact.
        lane = lax.broadcasted_iota(jnp.int32, (bt, sl, cp), 2)
        xc = jnp.where(lane < c_valid, xc, 0.0)
    var = jnp.sum(xc * xc, axis=-1, keepdims=True) * inv_c   # biased, as nn.LayerNorm
    inv = lax.rsqrt(var + eps)                               # EUP

    gamma = gamma_ref[...].astype(jnp.float32)               # (1, Cp) -> broadcasts
    y = xc * inv * gamma                                     # beta cancels exactly

    # --- subtract per-(batch, channel) mean over the sequence axis ---
    seq_bias = jnp.mean(y, axis=1, keepdims=True)            # (Bt, 1, Cp)
    o_ref[...] = (y - seq_bias).astype(o_ref.dtype)


def my_layernorm(x, gamma, beta=None, *, eps=1e-5, block_b=None):
    """x: (B, L, C); gamma/beta: (C,) LayerNorm affine params.

    beta is accepted for API parity with nn.LayerNorm but is mathematically
    unused: it cancels exactly in x_hat - mean_L(x_hat).
    """
    del beta  # exact algebraic cancellation
    B, L, C = x.shape

    # --- lane-density guard: pad channels to a multiple of 128 ---
    Cp = -(-C // 128) * 128
    if Cp != C:
        x = jnp.pad(x, ((0, 0), (0, 0), (0, Cp - C)))
        gamma = jnp.pad(gamma, ((0, Cp - C),))

    # --- generation-aware VMEM limit / block budget ---
    try:
        vmem_cap = int(getattr(pltpu.get_tpu_info(), "vmem_capacity_bytes",
                               64 * 1024 * 1024))
    except Exception:  # no TPU info available at trace time
        vmem_cap = 64 * 1024 * 1024
    small_vmem = vmem_cap <= 64 * 1024 * 1024            # v7x-class (64 MiB/TC)
    vmem_limit = max(32 * 1024 * 1024,
                     min(vmem_cap - 16 * 1024 * 1024, 96 * 1024 * 1024))
    budget_bytes = (4 if small_vmem else 8) * 1024 * 1024

    if block_b is None:
        per_batch = max(L * Cp * 4, 1)
        block_b = max(1, min(B, budget_bytes // per_batch))
        # Keep >=2 grid steps when B >= 2 so the "parallel" batch axis can be
        # sharded across both TensorCores on v7x (no-op cost on 1-TC chips).
        if B >= 2:
            block_b = min(block_b, max(1, B // 2))
        while B % block_b != 0:
            block_b -= 1
    assert B % block_b == 0

    grid = (B // block_b,)
    gamma2 = gamma.reshape(1, Cp)

    kernel = functools.partial(_my_layernorm_kernel, eps=eps, c_valid=C)
    out = pl.pallas_call(
        kernel,
        out_shape=jax.ShapeDtypeStruct((B, L, Cp), x.dtype),
        grid=grid,
        in_specs=[
            pl.BlockSpec((block_b, L, Cp), lambda i: (i, 0, 0)),
            pl.BlockSpec((1, Cp), lambda i: (0, 0)),
        ],
        out_specs=pl.BlockSpec((block_b, L, Cp), lambda i: (i, 0, 0)),
        compiler_params=pltpu.CompilerParams(
            dimension_semantics=("parallel",),
            vmem_limit_bytes=int(vmem_limit),
        ),
    )(x, gamma2)

    if Cp != C:
        out = out[..., :C]
    return out


def _reference(x, gamma, beta, eps=1e-5):
    """Pure-JAX reference matching the PyTorch forward exactly (beta included)."""
    mu = jnp.mean(x, axis=-1, keepdims=True)
    var = jnp.mean((x - mu) ** 2, axis=-1, keepdims=True)
    x_hat = (x - mu) / jnp.sqrt(var + eps) * gamma + beta
    seq_bias = jnp.mean(x_hat, axis=1, keepdims=True)
    return x_hat - seq_bias


if __name__ == "__main__":
    key = jax.random.PRNGKey(0)
    kx, kg, kb = jax.random.split(key, 3)

    # Lane-dense case: C = 128.
    B, L, C = 4, 16, 128
    x = jax.random.normal(kx, (B, L, C), dtype=jnp.float32)
    gamma = 1.0 + 0.1 * jax.random.normal(kg, (C,), dtype=jnp.float32)
    beta = 0.1 * jax.random.normal(kb, (C,), dtype=jnp.float32)

    out = my_layernorm(x, gamma, beta)
    jax.block_until_ready(out)
    out_ref = _reference(x, gamma, beta)
    assert jnp.allclose(out, out_ref, atol=1e-5, rtol=1e-5), "output mismatch (C=128)"

    # Non-multiple-of-128 channel case exercises the padding/masking guard.
    B2, L2, C2 = 2, 8, 96
    x2 = jax.random.normal(kx, (B2, L2, C2), dtype=jnp.float32)
    gamma2 = 1.0 + 0.1 * jax.random.normal(kg, (C2,), dtype=jnp.float32)
    beta2 = 0.1 * jax.random.normal(kb, (C2,), dtype=jnp.float32)

    out2 = my_layernorm(x2, gamma2, beta2)
    jax.block_until_ready(out2)
    out2_ref = _reference(x2, gamma2, beta2)
    assert jnp.allclose(out2, out2_ref, atol=1e-5, rtol=1e-5), "output mismatch (C=96)"

    print("KERNEL_OK")
</pallas_src>

<mosaic_0001>
module attributes {stable_mosaic.version = 11 : i64} {
  func.func @_my_layernorm_kernel(%arg0: i32, %arg1: memref<2x16x128xf32, #tpu.memory_space<vmem>>, %arg2: memref<1x128xf32, #tpu.memory_space<vmem>>, %arg3: memref<2x16x128xf32, #tpu.memory_space<vmem>>) attributes {dimension_semantics = [#tpu.dimension_semantics<parallel>], iteration_bounds = array<i64: 2>, scalar_prefetch = 0 : i64, scratch_operands = 0 : i64, tpu.core_type = #tpu.core_type<tc>, window_params = [{transform_indices = @transform_0, window_bounds = array<i64: 2, 16, 128>}, {pipeline_mode = #tpu.pipeline_mode<synchronous>, transform_indices = @transform_1, window_bounds = array<i64: 1, 128>}, {transform_indices = @transform_2, window_bounds = array<i64: 2, 16, 128>}]} {
    %c0 = arith.constant 0 : index
    %c0_0 = arith.constant 0 : index
    %c0_1 = arith.constant 0 : index
    %0 = vector.load %arg1[%c0, %c0_0, %c0_1] : memref<2x16x128xf32, #tpu.memory_space<vmem>>, vector<2x16x128xf32>
    %cst = arith.constant dense<0.000000e+00> : vector<2x16xf32>
    %1 = vector.multi_reduction <add>, %0, %cst [2] : vector<2x16x128xf32> to vector<2x16xf32>
    %2 = vector.shape_cast %1 : vector<2x16xf32> to vector<2x16x1xf32>
    %cst_2 = arith.constant 7.812500e-03 : f32
    %3 = vector.broadcast %cst_2 : f32 to vector<2x16x1xf32>
    %4 = arith.mulf %2, %3 : vector<2x16x1xf32>
    %5 = vector.broadcast %4 : vector<2x16x1xf32> to vector<2x16x128xf32>
    %6 = arith.subf %0, %5 : vector<2x16x128xf32>
    %7 = arith.mulf %6, %6 : vector<2x16x128xf32>
    %cst_3 = arith.constant dense<0.000000e+00> : vector<2x16xf32>
    %8 = vector.multi_reduction <add>, %7, %cst_3 [2] : vector<2x16x128xf32> to vector<2x16xf32>
    %9 = vector.shape_cast %8 : vector<2x16xf32> to vector<2x16x1xf32>
    %cst_4 = arith.constant 7.812500e-03 : f32
    %10 = vector.broadcast %cst_4 : f32 to vector<2x16x1xf32>
    %11 = arith.mulf %9, %10 : vector<2x16x1xf32>
    %cst_5 = arith.constant 9.99999974E-6 : f32
    %12 = vector.broadcast %cst_5 : f32 to vector<2x16x1xf32>
    %13 = arith.addf %11, %12 : vector<2x16x1xf32>
    %14 = math.rsqrt %13 : vector<2x16x1xf32>
    %c0_6 = arith.constant 0 : index
    %c0_7 = arith.constant 0 : index
    %15 = vector.load %arg2[%c0_6, %c0_7] : memref<1x128xf32, #tpu.memory_space<vmem>>, vector<1x128xf32>
    %16 = vector.broadcast %14 : vector<2x16x1xf32> to vector<2x16x128xf32>
    %17 = arith.mulf %6, %16 : vector<2x16x128xf32>
    %18 = vector.shape_cast %15 : vector<1x128xf32> to vector<1x1x128xf32>
    %19 = vector.broadcast %18 : vector<1x1x128xf32> to vector<2x16x128xf32>
    %20 = arith.mulf %17, %19 : vector<2x16x128xf32>
    %cst_8 = arith.constant dense<0.000000e+00> : vector<2x128xf32>
    %21 = vector.multi_reduction <add>, %20, %cst_8 [1] : vector<2x16x128xf32> to vector<2x128xf32>
    %22 = vector.shape_cast %21 : vector<2x128xf32> to vector<2x1x128xf32>
    %cst_9 = arith.constant 1.600000e+01 : f32
    %23 = vector.broadcast %cst_9 : f32 to vector<2x1x128xf32>
    %24 = arith.divf %22, %23 : vector<2x1x128xf32>
    %25 = vector.broadcast %24 : vector<2x1x128xf32> to vector<2x16x128xf32>
    %26 = arith.subf %20, %25 : vector<2x16x128xf32>
    %c0_10 = arith.constant 0 : index
    %c0_11 = arith.constant 0 : index
    %c0_12 = arith.constant 0 : index
    %27 = vector.load %arg3[%c0_10, %c0_11, %c0_12] : memref<2x16x128xf32, #tpu.memory_space<vmem>>, vector<2x16x128xf32>
    tpu.vector_store %arg3[%c0_10, %c0_11, %c0_12], %26 {strides = array<i32>} : memref<2x16x128xf32, #tpu.memory_space<vmem>>, vector<2x16x128xf32>,
    return
  }
  func.func @transform_0(%arg0: i32) -> (i32, i32, i32) {
    %c0_i32 = arith.constant 0 : i32
    %c0_i32_0 = arith.constant 0 : i32
    %c0_i32_1 = arith.constant 0 : i32
    return %arg0, %c0_i32, %c0_i32_0 : i32, i32, i32
  }
  func.func @transform_1(%arg0: i32) -> (i32, i32) {
    %c0_i32 = arith.constant 0 : i32
    %c0_i32_0 = arith.constant 0 : i32
    %c0_i32_1 = arith.constant 0 : i32
    return %c0_i32, %c0_i32_0 : i32, i32
  }
  func.func @transform_2(%arg0: i32) -> (i32, i32, i32) {
    %c0_i32 = arith.constant 0 : i32
    %c0_i32_0 = arith.constant 0 : i32
    %c0_i32_1 = arith.constant 0 : i32
    return %arg0, %c0_i32, %c0_i32_0 : i32, i32, i32
  }
}

</mosaic_0001>

<bundles_post_ra>
// kernel: tpu_custom_call.1
= control target key start
LH: loop header
LB: loop body
LE: loop exit
PB: predicated region body
PF: predicated region fallthrough
CT: control target
= control target key end

     0   :  { %7 = vsyncpa [#allocation3], 0  ;;  %s704_s0 = inlined_call_operand.hbm [shape: f32[4,16,128], index: 0, kind: input, shape index: {}]   ;;  %s705_s1 = inlined_call_operand.vmem [shape: f32[1,128], index: 1, kind: input, shape index: {}]   ;;  %s706_s2 = inlined_call_operand.hbm [shape: f32[4,16,128], index: 2, kind: output, shape index: {}]  }
   0x1   :  { %9 = vsyncpa [#allocation3 + $0x1], 0 }
   0x2   :  { %10 = vsyncpa [#allocation4], 0 }
   0x3   :  { %12 = vsyncpa [#allocation4 + $0x1], 0  ;;  %s535_s9 = smov 0   ;;  %s537_s10 = smov 0  }
   0x4   :  { %s539_s11 = smov 0   ;;  %s541_s12 = smov 0  }
   0x5 LB: > { %s556_s13 = sadd.s32 4294967295, %s512_s12   ;;  %s337_s14 = sadd.s32 4294967294, %s512_s12   ;;  %s512_s12 = sphi %s541_s12, %s719_s12   ;;  %s508_s11 = sphi %s539_s11, %s718_s11   ;;  %s504_s10 = sphi %s537_s10, %s717_s10   ;;  %s500_s9 = sphi %s535_s9, %s716_s9  }
   0x6   : > { %s560_s15 = sadd.s32 1, %s512_s12   ;;  %s25_s16 = sadd.s32 1, %s508_s11 }
   0x7   : > { %s22_s17 = ssub.s32 %s512_s12, %s560_s15  ;;  %p32_p0 = scmp.ne.s32.totalorder %s508_s11, %s504_s10 }
   0x8   : > { %p23_p1 = scmp.eq.s32.totalorder %s22_s17, 0  ;;  %p33_p2 = scmp.eq.s32.totalorder %s512_s12, 0 }
   0x9   : > { %p38_p3 = scmp.ne.s32.totalorder %s504_s10, %s500_s9  ;;  %p39_p4 = scmp.eq.s32.totalorder %s556_s13, 0 }
   0xa   : > { %s572_s18 = scalar_select %p23_p1, %s508_s11, %s25_s16  }
   0xb   : > { %p574_p5 = por %p33_p2, %p32_p0  ;;  %p578_p6 = por %p39_p4, %p38_p3 }
   0xc   : > { %p83_p7 = scmp.eq.s32.totalorder %s556_s13, 1  ;;  %p89_p8 = scmp.eq.s32.totalorder %s337_s14, 1 }
   0xd   : > { %p370_p10 = scmp.lt.s32.totalorder %s512_s12, 2  ;;  %s112_s23 = sand.u32 1, %s508_s11  }
   0xe   : > { %p585_p11 = por %p83_p7, %p32_p0  ;;  %p589_p12 = por %p89_p8, %p38_p3 }
   0xf   : > { %s355_s24 = sshll.u32 %s512_s12, 9  ;;  %s340_s25 = sshll.u32 %s112_s23, 5 }
  0x10   : > { %s710_s21 = scalar_select %p585_p11, 1, 0 }
  0x11   : > { %s711_s22 = scalar_select %p589_p12, 1, 0 }
  0x12   : > { %s598_s28 = scalar_lea.hbm %s704_s0, %s355_s24  ;;  %s116_s29 = scalar_lea.vmem [#allocation2], %s340_s25 }
  0x13   : > { %s124_s30 = sshll.u32 %s116_s29, 4  ;;  %p602_p13 = pnand %p370_p10, %p574_p5  ;;  %s606_s30 = int_to_ptr.vmem [resolvable:$true] %s124_s30 }
  0x14   : > { %s608_s4 = scalar_lea.sflag [#allocation3], %s112_s23  ;;  %s416_s5 = scalar_lea.hbm %s598_s28, 512 }
  0x15   : > { %p417_p0 = scmp.ne.s32.totalorder %s598_s28, %s416_s5  ;;  %p418_p1 = pneg %p602_p13 }
  0x16   : > { %s421_s8 = scalar_lea.hbm %s704_s0, 1024  ;;  %p422_p4 = scmp.lt.u32.totalorder %s598_s28, %s704_s0 }
  0x17   : > { %p419_p2 = pnand %p418_p1, %p417_p0  ;;  %p423_p5 = scmp.lt.u32.totalorder %s421_s8, %s416_s5 }
  0x18   : > { %p425_p8 = scmp.lt.u32.totalorder %s416_s5, %s598_s28 }
  0x19   : > { %p420_p3 = pneg %p419_p2  ;;  %p424_p7 = por %p423_p5, %p422_p4 }
  0x1b   : > { %p426_p10 = por %p425_p8, %p424_p7 }
  0x1d   : > { %p427_p9 = pnand %p426_p10, %p420_p3 }
  0x1f   : > { %430 = shalt.err (!%p427_p9)
}
  0x20   : > { %s431_s17 = scalar_lea.vmem %s606_s30, 512  ;;  %s514_s19 = smov [#allocation2]  }
  0x21   : > { %p432_p0 = scmp.ne.s32.totalorder %s606_s30, %s431_s17  ;;  %s436_s23 = sshll.u32 %s514_s19, 4  ;;  %s437_s23 = int_to_ptr.vmem [resolvable:$false] %s436_s23 }
  0x22   : > { %s438_s24 = scalar_lea.vmem %s437_s23, 1024  ;;  %p439_p11 = scmp.lt.s32.totalorder %s606_s30, %s437_s23 }
  0x23   : > { %p434_p2 = pnand %p432_p0, %p418_p1  ;;  %p440_p4 = scmp.lt.s32.totalorder %s438_s24, %s431_s17 }
  0x25   : > { %p435_p12 = pneg %p434_p2  ;;  %p441_p5 = por %p440_p4, %p439_p11 }
  0x27   : > { %p442_p7 = pnand %p441_p5, %p435_p12 }
  0x29   : > { %445 = shalt.err (!%p442_p7)
}
  0x2a   : > { %s515_s25 = smov 128   ;;  %s516_s26 = smov 8  }
  0x2b   : > { %365 = dma.hbm_to_vmem [thread:$0]  (!%p602_p13), %s598_s28, 512, %s606_s30, %s608_s4, %s515_s25, %s515_s25, %s516_s26  }
  0x2c   : > { %p344_p9 = scmp.ge.s32.totalorder %s512_s12, 1  ;;  %p132_p1 = scmp.lt.s32.totalorder %s512_s12, 3 }
  0x2e   : > { %p133_p3 = pnand %p344_p9, %p132_p1 }
  0x2f   : > { %s639_s27 = sand.u32 (!%p133_p3), 1, %s504_s10  }
  0x30   : > { %136 = sbr.rel (%p133_p3) target bundleno = 407 (0x197), region = 28  ;;  %s345_s29 = sshll.u32 (!%p133_p3), %s639_s27, 5 }
  0x31   : > { %s139_s5 = scalar_lea.sflag (!%p133_p3), [#allocation3], %s639_s27  ;;  %s142_s6 = scalar_lea.vmem (!%p133_p3), [#allocation2], %s345_s29 }
  0x37   : > { %491 = dma.done.wait (%p578_p6), %s139_s5, 512  }
  0x38   : > { %493 = vsyncadd (%p578_p6), %s139_s5, 4294966784  ;;  %v165_v0 = vld [vmem:[%s142_s6] sm:$0xff]  ;;  %v167_v1 = vld [vmem:[%s142_s6 + $0x10] sm:$0xff]  ;;  %s357_s30 = sshll.u32 %s556_s13, 9  ;;  %s162_s3 = scalar_lea.vmem [#allocation5], %s345_s29 }
  0x39   : > { %169 = vadd.xlane.f32.xlu0 %v165_v0  ;;  %173 = vadd.xlane.f32.xlu1 %v167_v1  ;;  %v166_v2 = vld [vmem:[%s142_s6 + $0x8] sm:$0xff]  ;;  %v168_v3 = vld [vmem:[%s142_s6 + $0x18] sm:$0xff]  ;;  %v347_v35 = vld [vmem:[%s705_s1] ss:$0 sm:$0xff]  ;;  %s264_s4 = sshll.u32 %s162_s3, 4  ;;  %s658_s14 = scalar_lea.hbm %s706_s2, %s357_s30  ;;  %s660_s4 = int_to_ptr.vmem [resolvable:$true] %s264_s4 }
  0x3a   : > { %s250_s13 = scalar_lea.sflag [#allocation4], %s639_s27  ;;  %s446_s16 = scalar_lea.vmem %s660_s4, 512 }
  0x3b   : > { %p447_p6 = scmp.ne.s32.totalorder %s660_s4, %s446_s16  ;;  %p713_p11 = scmp.ne.s32.totalorder %s710_s21, 0 }
  0x3c   : > { %s517_s17 = smov [#allocation5]  }
  0x3d   : > { %171 = vadd.xlane.f32.xlu0 %v166_v2  ;;  %175 = vadd.xlane.f32.xlu1 %v168_v3  ;;  %p448_p12 = pnand %p447_p6, %p713_p11  ;;  %s450_s19 = sshll.u32 %s517_s17, 4  ;;  %s451_s19 = int_to_ptr.vmem [resolvable:$false] %s450_s19 }
  0x3e   : > { %s452_s23 = scalar_lea.vmem %s451_s19, 1024  ;;  %p453_p8 = scmp.lt.s32.totalorder %s660_s4, %s451_s19 }
  0x3f   : > { %p449_p13 = pneg %p448_p12  ;;  %p454_p10 = scmp.lt.s32.totalorder %s452_s23, %s446_s16 }
  0x41   : > { %p455_p0 = por %p454_p10, %p453_p8 }
  0x43   : > { %p456_p2 = pnand %p455_p0, %p449_p13 }
  0xc6   : > { %v170_v4 = vpop.xlane.xlu0 %169  ;;  %v174_v5 = vpop.xlane.xlu1 %173 }
  0xc7   : > { %v177_v6 = vmul.f32 0.0078125, %v170_v4  ;;  %v179_v7 = vmul.f32 0.0078125, %v174_v5 }
  0xc9   : > { %v181_v8 = vsub.f32 %v165_v0, %v177_v6  ;;  %v183_v9 = vsub.f32 %v167_v1, %v179_v7 }
  0xca   : > { %v172_v10 = vpop.xlane.xlu0 %171  ;;  %v176_v11 = vpop.xlane.xlu1 %175 }
  0xcb   : > { %v178_v12 = vmul.f32 0.0078125, %v172_v10  ;;  %v185_v13 = vmul.f32 %v181_v8, %v181_v8  ;;  %v180_v14 = vmul.f32 0.0078125, %v176_v11  ;;  %v187_v17 = vmul.f32 %v183_v9, %v183_v9 }
  0xcd   : > { %v182_v15 = vsub.f32 %v166_v2, %v178_v12  ;;  %189 = vadd.xlane.f32.xlu0 %v185_v13  ;;  %v184_v16 = vsub.f32 %v168_v3, %v180_v14 }
  0xcf   : > { %v186_v18 = vmul.f32 %v182_v15, %v182_v15  ;;  %v188_v19 = vmul.f32 %v184_v16, %v184_v16 }
  0xd1   : > { %193 = vadd.xlane.f32.xlu0 %v187_v17  ;;  %191 = vadd.xlane.f32.xlu1 %v186_v18 }
  0xd5   : > { %195 = vadd.xlane.f32.xlu1 %v188_v19 }
 0x15a   : > { %v190_v20 = vpop.xlane.xlu0 %189 }
 0x15b   : > { %v197_v21 = vmul.f32 0.0078125, %v190_v20 }
 0x15d   : > { %v201_v22 = vadd.f32 1e-05, %v197_v21 }
 0x15e   : > { %v192_v23 = vpop.xlane.xlu1 %191  ;;  %v194_v24 = vpop.xlane.xlu0 %193 }
 0x15f   : > { %408 = vrsqrt.f32 %v201_v22  ;;  %v198_v25 = vmul.f32 0.0078125, %v192_v23  ;;  %v199_v26 = vmul.f32 0.0078125, %v194_v24 }
 0x161   : > { %v202_v27 = vadd.f32 1e-05, %v198_v25  ;;  %v203_v28 = vadd.f32 1e-05, %v199_v26 }
 0x162   : > { %v196_v29 = vpop.xlane.xlu1 %195 }
 0x163   : > { %410 = vrsqrt.f32 %v202_v27  ;;  %v200_v30 = vmul.f32 0.0078125, %v196_v29 }
 0x164   : > { %412 = vrsqrt.f32 %v203_v28 }
 0x165   : > { %v204_v31 = vadd.f32 1e-05, %v200_v30 }
 0x167   : > { %414 = vrsqrt.f32 %v204_v31 }
 0x169   : > { %v409_v32 = vpop.eup %408 }
 0x16a   : > { %v210_v33 = vmul.f32 %v409_v32, %v181_v8 }
 0x16c   : > { %v220_v38 = vmul.f32 %v347_v35, %v210_v33 }
 0x16d   : > { %v411_v34 = vpop.eup %410 }
 0x16e   : > { %v413_v36 = vpop.eup %412  ;;  %v211_v37 = vmul.f32 %v411_v34, %v182_v15 }
 0x16f   : > { %v212_v40 = vmul.f32 %v413_v36, %v183_v9 }
 0x170   : > { %v221_v39 = vmul.f32 %v347_v35, %v211_v37 }
 0x171   : > { %v415_v41 = vpop.eup %414  ;;  %v222_v45 = vmul.f32 %v347_v35, %v212_v40 }
 0x172   : > { %v224_v42 = vadd.f32 %v221_v39, %v220_v38  ;;  %v213_v43 = vmul.f32 %v415_v41, %v184_v16 }
 0x174   : > { %v225_v44 = vrot.slane %v224_v42, 4  ;;  %v223_v46 = vmul.f32 %v347_v35, %v213_v43 }
 0x176   : > { %v226_v47 = vadd.f32 %v225_v44, %v224_v42  ;;  %v231_v48 = vadd.f32 %v223_v46, %v222_v45 }
 0x178   : > { %v227_v49 = vrot.slane %v226_v47, 2  ;;  %v232_v50 = vrot.slane %v231_v48, 4 }
 0x17a   : > { %v228_v51 = vadd.f32 %v227_v49, %v226_v47  ;;  %v233_v52 = vadd.f32 %v232_v50, %v231_v48 }
 0x17c   : > { %v229_v53 = vrot.slane %v228_v51, 1  ;;  %v234_v54 = vrot.slane %v233_v52, 2 }
 0x17e   : > { %v230_v55 = vadd.f32 %v229_v53, %v228_v51  ;;  %v235_v56 = vadd.f32 %v234_v54, %v233_v52 }
 0x180   : > { %v239_v57 = vmul.f32 0.0625, %v230_v55  ;;  %v236_v58 = vrot.slane %v235_v56, 1 }
 0x182   : > { %v241_v59 = vsub.f32 %v220_v38, %v239_v57  ;;  %v242_v60 = vsub.f32 %v221_v39, %v239_v57  ;;  %v237_v61 = vadd.f32 %v236_v58, %v235_v56 }
 0x184   : > { %246 = vst [vmem:[%s162_s3 + $0x8] sm:$0xff] %v242_v60  ;;  %245 = vst [vmem:[%s162_s3] sm:$0xff] %v241_v59  ;;  %v240_v62 = vmul.f32 0.0625, %v237_v61 }
 0x186   : > { %v243_v63 = vsub.f32 %v222_v45, %v240_v62  ;;  %v244_v0 = vsub.f32 %v223_v46, %v240_v62 }
 0x188   : > { %247 = vst [vmem:[%s162_s3 + $0x10] sm:$0xff] %v243_v63  ;;  %248 = vst [vmem:[%s162_s3 + $0x18] sm:$0xff] %v244_v0 }
 0x189   : > { %459 = shalt.err (!%p456_p2)
}
 0x18a   : > { %s460_s24 = scalar_lea.hbm %s658_s14, 512  ;;  %s464_s29 = scalar_lea.hbm %s706_s2, 1024 }
 0x18b   : > { %p461_p4 = scmp.ne.s32.totalorder %s658_s14, %s460_s24  ;;  %p465_p9 = scmp.lt.u32.totalorder %s658_s14, %s706_s2 }
 0x18c   : > { %p466_p1 = scmp.lt.u32.totalorder %s464_s29, %s460_s24  ;;  %p468_p6 = scmp.lt.u32.totalorder %s460_s24, %s658_s14 }
 0x18d   : > { %p462_p5 = pnand %p461_p4, %p713_p11 }
 0x18e   : > { %p467_p3 = por %p466_p1, %p465_p9 }
 0x18f   : > { %p463_p7 = pneg %p462_p5 }
 0x190   : > { %p469_p12 = por %p468_p6, %p467_p3 }
 0x192   : > { %p470_p13 = pnand %p469_p12, %p463_p7 }
 0x194   : > { %473 = shalt.err (!%p470_p13)
}
 0x195   : > { %s518_s20 = smov 128   ;;  %s519_s28 = smov 8  }
 0x196   : > { %360 = dma.vmem_to_hbm [thread:$0]  (%p713_p11), %s660_s4, 512, %s658_s14, %s250_s13, %s518_s20, %s518_s20, %s519_s28  }
 0x197 PF: > { %s279_s30 = sand.u32 1, %s500_s9   ;;  %p714_p8 = scmp.ne.s32.totalorder %s711_s22, 0 }
 0x198   : > { %p715_p10 = scmp.ge.s32.totalorder %s512_s12, 2  ;;  %s280_s3 = scalar_lea.sflag [#allocation4], %s279_s30 }
 0x19a   : > { %p367_p0 = pnand %p715_p10, %p714_p8 }
 0x19c   : > { %495 = dma.done.wait (!%p367_p0), %s280_s3, 512  }
 0x19d   : > { %497 = vsyncadd (!%p367_p0), %s280_s3, 4294966784  ;;  %p15_p2 = scmp.ge.s32.totalorder %s560_s15, 4   ;;  %s716_s9 = smov %s504_s10 }
 0x19e   : > { %s717_s10 = smov %s508_s11  ;;  %s718_s11 = smov %s572_s18 }
 0x19f   : > { %s719_s12 = smov %s560_s15  ;;  %17 = sbr.rel (!%p15_p2) target bundleno = 5 (0x5), region = 73 }
 0x1a6   :  { %285 = vsyncpa [#allocation3], 1 }
 0x1a7   :  { %287 = vsyncpa [#allocation3 + $0x1], 1 }
 0x1a8   :  { %288 = vsyncpa [#allocation4], 1 }
 0x1a9   :  { %290 = vsyncpa [#allocation4 + $0x1], 1 }

</bundles_post_ra>
